<compile_context>
chip_gen: v7x
topology: tpu7x:2x2x1
jax: 0.10.0
libtpu: 0.0.40
codegen_flags: <defaults>
</compile_context>

<pallas_src>
import functools

import jax
import jax.numpy as jnp
from jax.experimental import pallas as pl
from jax.experimental.pallas import tpu as pltpu

# Packed "tail" operand layout, (1, _TAIL_W) f32 — all offsets are multiples
# of 128 lanes.
_B1, _B1_W = 0, 512       # fc1 bias
_B2, _B2_W = 512, 256     # fc2 bias
_B3, _B3_W = 768, 128     # fc3 bias (64 real + 64 zero-pad lanes)
_WV, _WV_W = 896, 128     # value-head weight row (64 real + 64 zero-pad lanes)
_BV, _BV_W = 1024, 1      # value-head bias
_TAIL_W = 1152            # 9 * 128 lanes


def _critic_kernel(x_ref, w1_ref, w2_ref, w3_ref, tail_ref, out_ref, *, row_out):
    # x: (TM, state_dim) f32; cast to bf16 only at the MXU feeds.
    x = x_ref[...].astype(jnp.bfloat16)

    h = jnp.dot(x, w1_ref[...], preferred_element_type=jnp.float32)
    h = jnp.maximum(h + tail_ref[:, _B1:_B1 + _B1_W], 0.0)

    h = jnp.dot(h.astype(jnp.bfloat16), w2_ref[...],
                preferred_element_type=jnp.float32)
    h = jnp.maximum(h + tail_ref[:, _B2:_B2 + _B2_W], 0.0)

    h = jnp.dot(h.astype(jnp.bfloat16), w3_ref[...],
                preferred_element_type=jnp.float32)
    h = jnp.maximum(h + tail_ref[:, _B3:_B3 + _B3_W], 0.0)   # (TM, 128), cols 64.. are zero

    # Value head (64 -> 1): N=1 is a terrible MXU shape, so use the VPU
    # (broadcast-multiply) plus an XLU reduction instead.
    wv = tail_ref[:, _WV:_WV + _WV_W]        # (1, 128) f32 (zero-padded)
    bv = tail_ref[:, _BV:_BV + _BV_W]        # (1, 1)   f32
    hw = h * wv                              # (TM, 128)

    if row_out:
        # Lane-dense output: transpose (TM,128)->(128,TM) on the XLU (both
        # dims tile-aligned here), reduce over sublanes -> (1, TM) row.
        v = jnp.sum(hw.T, axis=0, keepdims=True) + bv        # (1, TM)
    else:
        # Tiny-batch path: plain lane reduce -> (TM, 1) column.
        v = jnp.sum(hw, axis=-1, keepdims=True) + bv          # (TM, 1)

    out_ref[...] = v.astype(out_ref.dtype)


def critic_forward(state, params, *, tm=512):
    """state: (B, state_dim) f32 -> value: (B, 1) f32.

    tm: max batch-tile rows per grid step (512 works well on v5e/v6e/v7x —
    per-step overhead dominates, so bigger tiles amortize it; VMEM use at
    tm=512 is only a few MB). Small batches collapse to a single bucketed tile.
    """
    w1, w2, w3, tail = params
    B, sdim = state.shape
    if w1.shape[0] != sdim:
        raise ValueError(f"state_dim mismatch: {sdim} vs {w1.shape[0]}")

    # Power-of-two bucketing of the tile size -> stable Mosaic compiles across
    # fluctuating RL batch sizes.
    tm_eff = min(pl.next_power_of_2(max(B, 8)), tm)
    grid_n = pl.cdiv(B, tm_eff)
    # Ensure >= 2 grid steps when there is enough work, so the "parallel" grid
    # axis shards across both TensorCores on v7x.
    if grid_n == 1 and tm_eff > 256:
        tm_eff //= 2
        grid_n = pl.cdiv(B, tm_eff)

    row_out = (tm_eff % 128 == 0)   # lane-dense output only when fully aligned

    flops = 2 * B * (sdim * 512 + 512 * 256 + 256 * 64 + 64)
    bytes_accessed = (B * (sdim + 1) * 4
                      + w1.size * 2 + w2.size * 2 + w3.size * 2 + tail.size * 4)
    cost = pl.CostEstimate(flops=flops, transcendentals=0,
                           bytes_accessed=bytes_accessed)

    if row_out:
        out_shape = jax.ShapeDtypeStruct((1, B), jnp.float32)
        out_spec = pl.BlockSpec((1, tm_eff), lambda i: (0, i))
    else:
        out_shape = jax.ShapeDtypeStruct((B, 1), jnp.float32)
        out_spec = pl.BlockSpec((tm_eff, 1), lambda i: (i, 0))

    out = pl.pallas_call(
        functools.partial(_critic_kernel, row_out=row_out),
        out_shape=out_shape,
        grid=(grid_n,),
        in_specs=[
            pl.BlockSpec((tm_eff, sdim), lambda i: (i, 0)),   # x: batch-tiled
            pl.BlockSpec(w1.shape, lambda i: (0, 0)),         # weights: constant block
            pl.BlockSpec(w2.shape, lambda i: (0, 0)),         #  -> fetched once, stay
            pl.BlockSpec(w3.shape, lambda i: (0, 0)),         #     VMEM-resident
            pl.BlockSpec(tail.shape, lambda i: (0, 0)),       # packed biases + head
        ],
        out_specs=out_spec,
        compiler_params=pltpu.CompilerParams(
            dimension_semantics=("parallel",)),
        cost_estimate=cost,
    )(state, w1, w2, w3, tail)

    return out.reshape(B, 1) if row_out else out


def init_critic_params(key, state_dim, std=0.01):
    """Matches the PyTorch init (normal(std) weights, zero biases).

    Weights are stored transposed ((in, out)) so each layer is `x @ W`.
    The three big matrices are stored bf16 (f32 accumulation in-kernel); fc3's
    output dim is zero-padded 64 -> 128; the biases and the 64->1 value head
    are packed into one (1, 1152) f32 array.
    """
    k1, k2, k3, kv = jax.random.split(key, 4)
    w1 = (std * jax.random.normal(k1, (state_dim, 512), jnp.float32)).astype(jnp.bfloat16)
    w2 = (std * jax.random.normal(k2, (512, 256), jnp.float32)).astype(jnp.bfloat16)
    w3_real = std * jax.random.normal(k3, (256, 64), jnp.float32)
    w3 = jnp.zeros((256, 128), jnp.float32).at[:, :64].set(w3_real).astype(jnp.bfloat16)
    wv = std * jax.random.normal(kv, (64,), jnp.float32)

    # Packed tail: [b1 | b2 | b3(pad128) | wv_row(pad128) | bv | pad].
    # Biases are zero per the PyTorch init; only the value-head row is nonzero.
    tail = jnp.zeros((1, _TAIL_W), dtype=jnp.float32)
    tail = tail.at[0, _WV:_WV + 64].set(wv)
    return (w1, w2, w3, tail)


def critic_reference(state, params):
    """Plain-JAX reference using the same dtypes/layout as the kernel."""
    w1, w2, w3, tail = params
    b1 = tail[:, _B1:_B1 + _B1_W]
    b2 = tail[:, _B2:_B2 + _B2_W]
    b3 = tail[:, _B3:_B3 + _B3_W]
    wv = tail[:, _WV:_WV + _WV_W]
    bv = tail[:, _BV:_BV + _BV_W]
    h = jnp.maximum(jnp.dot(state.astype(jnp.bfloat16), w1,
                            preferred_element_type=jnp.float32) + b1, 0.0)
    h = jnp.maximum(jnp.dot(h.astype(jnp.bfloat16), w2,
                            preferred_element_type=jnp.float32) + b2, 0.0)
    h = jnp.maximum(jnp.dot(h.astype(jnp.bfloat16), w3,
                            preferred_element_type=jnp.float32) + b3, 0.0)
    return jnp.sum(h * wv, axis=-1, keepdims=True) + bv


if __name__ == "__main__":
    state_dim = 24   # BipedalWalker-v3 observation size

    key = jax.random.PRNGKey(0)
    k_params, k_s1, k_s2 = jax.random.split(key, 3)
    # std=0.25 for the self-test so output magnitudes are O(1) and the
    # comparison is numerically meaningful (the default std=0.01 of the
    # PyTorch init gives ~1e-5-scale values).
    params = init_critic_params(k_params, state_dim, std=0.25)

    # Small batch exercises the column-output path; the larger batch exercises
    # the bucketed multi-tile grid, partial last blocks and the lane-dense
    # row-output path.
    for batch, ks in ((8, k_s1), (384, k_s2)):
        state = jax.random.normal(ks, (batch, state_dim), dtype=jnp.float32)
        value = jax.block_until_ready(critic_forward(state, params))
        ref = critic_reference(state, params)
        assert value.shape == (batch, 1)
        assert jnp.allclose(value, ref, atol=2e-2, rtol=2e-2), (batch, value[:4], ref[:4])

    print("KERNEL_OK")
</pallas_src>

<mosaic_0001>
module attributes {stable_mosaic.version = 11 : i64} {
  func.func @_critic_kernel(%arg0: i32, %arg1: memref<8x24xf32, #tpu.memory_space<vmem>>, %arg2: memref<24x512xbf16, #tpu.memory_space<vmem>>, %arg3: memref<512x256xbf16, #tpu.memory_space<vmem>>, %arg4: memref<256x128xbf16, #tpu.memory_space<vmem>>, %arg5: memref<1x1152xf32, #tpu.memory_space<vmem>>, %arg6: memref<8x1xf32, #tpu.memory_space<vmem>>) attributes {dimension_semantics = [#tpu.dimension_semantics<parallel>], iteration_bounds = array<i64: 1>, scalar_prefetch = 0 : i64, scratch_operands = 0 : i64, tpu.core_type = #tpu.core_type<tc>, window_params = [{transform_indices = @transform_0, window_bounds = array<i64: 8, 24>}, {pipeline_mode = #tpu.pipeline_mode<synchronous>, transform_indices = @transform_1, window_bounds = array<i64: 24, 512>}, {pipeline_mode = #tpu.pipeline_mode<synchronous>, transform_indices = @transform_2, window_bounds = array<i64: 512, 256>}, {pipeline_mode = #tpu.pipeline_mode<synchronous>, transform_indices = @transform_3, window_bounds = array<i64: 256, 128>}, {pipeline_mode = #tpu.pipeline_mode<synchronous>, transform_indices = @transform_4, window_bounds = array<i64: 1, 1152>}, {transform_indices = @transform_5, window_bounds = array<i64: 8, 1>}]} {
    %c0 = arith.constant 0 : index
    %c0_0 = arith.constant 0 : index
    %0 = vector.load %arg1[%c0, %c0_0] : memref<8x24xf32, #tpu.memory_space<vmem>>, vector<8x24xf32>
    %1 = arith.truncf %0 : vector<8x24xf32> to vector<8x24xbf16>
    %c0_1 = arith.constant 0 : index
    %c0_2 = arith.constant 0 : index
    %2 = vector.load %arg2[%c0_1, %c0_2] : memref<24x512xbf16, #tpu.memory_space<vmem>>, vector<24x512xbf16>
    %cst = arith.constant dense<0.000000e+00> : vector<8x512xf32>
    %3 = tpu.matmul %1, %2, %cst {dimension_numbers = #tpu.dot_dimension_numbers<[1], [0], [0], [1], [0, 0, 1, 1], [], []>} : vector<8x24xbf16>, vector<24x512xbf16>, vector<8x512xf32> -> vector<8x512xf32>
    %c0_3 = arith.constant 0 : index
    %c0_4 = arith.constant 0 : index
    %4 = vector.load %arg5[%c0_3, %c0_4] : memref<1x1152xf32, #tpu.memory_space<vmem>>, vector<1x512xf32>
    %5 = vector.broadcast %4 : vector<1x512xf32> to vector<8x512xf32>
    %6 = arith.addf %3, %5 : vector<8x512xf32>
    %cst_5 = arith.constant 0.000000e+00 : f32
    %7 = vector.broadcast %cst_5 : f32 to vector<8x512xf32>
    %8 = arith.maximumf %6, %7 : vector<8x512xf32>
    %9 = arith.truncf %8 : vector<8x512xf32> to vector<8x512xbf16>
    %c0_6 = arith.constant 0 : index
    %c0_7 = arith.constant 0 : index
    %10 = vector.load %arg3[%c0_6, %c0_7] : memref<512x256xbf16, #tpu.memory_space<vmem>>, vector<512x256xbf16>
    %cst_8 = arith.constant dense<0.000000e+00> : vector<8x256xf32>
    %11 = tpu.matmul %9, %10, %cst_8 {dimension_numbers = #tpu.dot_dimension_numbers<[1], [0], [0], [1], [0, 0, 1, 1], [], []>} : vector<8x512xbf16>, vector<512x256xbf16>, vector<8x256xf32> -> vector<8x256xf32>
    %c0_9 = arith.constant 0 : index
    %c512 = arith.constant 512 : index
    %12 = vector.load %arg5[%c0_9, %c512] : memref<1x1152xf32, #tpu.memory_space<vmem>>, vector<1x256xf32>
    %13 = vector.broadcast %12 : vector<1x256xf32> to vector<8x256xf32>
    %14 = arith.addf %11, %13 : vector<8x256xf32>
    %cst_10 = arith.constant 0.000000e+00 : f32
    %15 = vector.broadcast %cst_10 : f32 to vector<8x256xf32>
    %16 = arith.maximumf %14, %15 : vector<8x256xf32>
    %17 = arith.truncf %16 : vector<8x256xf32> to vector<8x256xbf16>
    %c0_11 = arith.constant 0 : index
    %c0_12 = arith.constant 0 : index
    %18 = vector.load %arg4[%c0_11, %c0_12] : memref<256x128xbf16, #tpu.memory_space<vmem>>, vector<256x128xbf16>
    %cst_13 = arith.constant dense<0.000000e+00> : vector<8x128xf32>
    %19 = tpu.matmul %17, %18, %cst_13 {dimension_numbers = #tpu.dot_dimension_numbers<[1], [0], [0], [1], [0, 0, 1, 1], [], []>} : vector<8x256xbf16>, vector<256x128xbf16>, vector<8x128xf32> -> vector<8x128xf32>
    %c0_14 = arith.constant 0 : index
    %c768 = arith.constant 768 : index
    %20 = vector.load %arg5[%c0_14, %c768] : memref<1x1152xf32, #tpu.memory_space<vmem>>, vector<1x128xf32>
    %21 = vector.broadcast %20 : vector<1x128xf32> to vector<8x128xf32>
    %22 = arith.addf %19, %21 : vector<8x128xf32>
    %cst_15 = arith.constant 0.000000e+00 : f32
    %23 = vector.broadcast %cst_15 : f32 to vector<8x128xf32>
    %24 = arith.maximumf %22, %23 : vector<8x128xf32>
    %c0_16 = arith.constant 0 : index
    %c896 = arith.constant 896 : index
    %25 = vector.load %arg5[%c0_16, %c896] : memref<1x1152xf32, #tpu.memory_space<vmem>>, vector<1x128xf32>
    %c0_17 = arith.constant 0 : index
    %c1024 = arith.constant 1024 : index
    %26 = vector.load %arg5[%c0_17, %c1024] : memref<1x1152xf32, #tpu.memory_space<vmem>>, vector<1x1xf32>
    %27 = vector.broadcast %25 : vector<1x128xf32> to vector<8x128xf32>
    %28 = arith.mulf %24, %27 : vector<8x128xf32>
    %cst_18 = arith.constant dense<0.000000e+00> : vector<8xf32>
    %29 = vector.multi_reduction <add>, %28, %cst_18 [1] : vector<8x128xf32> to vector<8xf32>
    %30 = vector.shape_cast %29 : vector<8xf32> to vector<8x1xf32>
    %31 = vector.broadcast %26 : vector<1x1xf32> to vector<8x1xf32>
    %32 = arith.addf %30, %31 : vector<8x1xf32>
    %c0_19 = arith.constant 0 : index
    %c0_20 = arith.constant 0 : index
    %33 = vector.load %arg6[%c0_19, %c0_20] : memref<8x1xf32, #tpu.memory_space<vmem>>, vector<8x1xf32>
    tpu.vector_store %arg6[%c0_19, %c0_20], %32 {strides = array<i32>} : memref<8x1xf32, #tpu.memory_space<vmem>>, vector<8x1xf32>,
    return
  }
  func.func @transform_0(%arg0: i32) -> (i32, i32) {
    %c0_i32 = arith.constant 0 : i32
    %c0_i32_0 = arith.constant 0 : i32
    return %arg0, %c0_i32 : i32, i32
  }
  func.func @transform_1(%arg0: i32) -> (i32, i32) {
    %c0_i32 = arith.constant 0 : i32
    %c0_i32_0 = arith.constant 0 : i32
    %c0_i32_1 = arith.constant 0 : i32
    return %c0_i32, %c0_i32_0 : i32, i32
  }
  func.func @transform_2(%arg0: i32) -> (i32, i32) {
    %c0_i32 = arith.constant 0 : i32
    %c0_i32_0 = arith.constant 0 : i32
    %c0_i32_1 = arith.constant 0 : i32
    return %c0_i32, %c0_i32_0 : i32, i32
  }
  func.func @transform_3(%arg0: i32) -> (i32, i32) {
    %c0_i32 = arith.constant 0 : i32
    %c0_i32_0 = arith.constant 0 : i32
    %c0_i32_1 = arith.constant 0 : i32
    return %c0_i32, %c0_i32_0 : i32, i32
  }
  func.func @transform_4(%arg0: i32) -> (i32, i32) {
    %c0_i32 = arith.constant 0 : i32
    %c0_i32_0 = arith.constant 0 : i32
    %c0_i32_1 = arith.constant 0 : i32
    return %c0_i32, %c0_i32_0 : i32, i32
  }
  func.func @transform_5(%arg0: i32) -> (i32, i32) {
    %c0_i32 = arith.constant 0 : i32
    %c0_i32_0 = arith.constant 0 : i32
    return %arg0, %c0_i32 : i32, i32
  }
}

</mosaic_0001>

<bundles_post_ra>
// kernel: tpu_custom_call.1
= control target key start
LH: loop header
LB: loop body
LE: loop exit
PB: predicated region body
PF: predicated region fallthrough
CT: control target
= control target key end

     0   :  { %10 = vsyncpa [#allocation3], 0  ;;  %s1401_s0 = inlined_call_operand.hbm [shape: f32[8,24], index: 0, kind: input, shape index: {}]   ;;  %s1402_s1 = inlined_call_operand.hbm [shape: bf16[24,512], index: 1, kind: input, shape index: {}]   ;;  %s1403_s2 = inlined_call_operand.hbm [shape: bf16[512,256], index: 2, kind: input, shape index: {}]   ;;  %s1404_s3 = inlined_call_operand.hbm [shape: bf16[256,128], index: 3, kind: input, shape index: {}]   ;;  %s1405_s4 = inlined_call_operand.vmem [shape: f32[1,1152], index: 4, kind: input, shape index: {}]   ;;  %s1406_s5 = inlined_call_operand.vmem [shape: f32[8,1], index: 5, kind: output, shape index: {}]  }
   0x1   :  { %11 = vsyncpa [#allocation5], 0 }
   0x2   :  { %12 = vsyncpa [#allocation8], 0  ;;  %s1274_s18 = smov [#allocation4]   ;;  %s1180_s22 = scalar_lea.hbm %s1402_s1, 768 }
   0x3   :  { %s28_s19 = sshll.u32 %s1274_s18, 4  ;;  %p1181_p0 = scmp.ne.s32.totalorder %s1402_s1, %s1180_s22  ;;  %s29_s19 = int_to_ptr.vmem [resolvable:$true] %s28_s19 }
   0x4   :  { %p1184_p1 = scmp.lt.u32.totalorder %s1180_s22, %s1402_s1 }
   0x6   :  { %p1186_p2 = pnand %p1184_p1, %p1181_p0 }
   0x8   :  { %1189 = shalt.err (!%p1186_p2)
}
   0x9   :  { %s1190_s27 = scalar_lea.vmem %s29_s19, 768  ;;  %p1195_p4 = scmp.lt.s32.totalorder %s29_s19, %s29_s19 }
   0xa   :  { %p1191_p3 = scmp.ne.s32.totalorder %s29_s19, %s1190_s27  ;;  %p1196_p5 = scmp.lt.s32.totalorder %s1190_s27, %s1190_s27 }
   0xc   :  { %p1197_p6 = por %p1196_p5, %p1195_p4 }
   0xe   :  { %p1198_p7 = pnand %p1197_p6, %p1191_p3 }
  0x10   :  { %1201 = shalt.err (!%p1198_p7)
}
  0x11   :  { %s1275_s28 = smov 256   ;;  %s1276_s29 = smov 16  }
  0x12   :  { %34 = dma.hbm_to_vmem [thread:$0]  %s1402_s1, 768, %s29_s19, [#allocation5], %s1275_s28, %s1275_s28, %s1276_s29  }
  0x13   :  { %s1277_s7 = smov [#allocation2]   ;;  %s1278_s9 = smov [#allocation6]  }
  0x14   :  { %s19_s8 = sshll.u32 %s1277_s7, 4  ;;  %s40_s10 = sshll.u32 %s1278_s9, 4  ;;  %s20_s8 = int_to_ptr.vmem [resolvable:$true] %s19_s8  ;;  %s41_s10 = int_to_ptr.vmem [resolvable:$true] %s40_s10 }
  0x15   :  { %s1202_s13 = scalar_lea.hbm %s1401_s0, 128 }
  0x16   :  { %p1203_p8 = scmp.ne.s32.totalorder %s1401_s0, %s1202_s13  ;;  %p1206_p9 = scmp.lt.u32.totalorder %s1202_s13, %s1401_s0 }
  0x18   :  { %p1208_p10 = pnand %p1206_p9, %p1203_p8 }
  0x1a   :  { %1211 = shalt.err (!%p1208_p10)
}
  0x1b   :  { %s1212_s1 = scalar_lea.vmem %s20_s8, 128  ;;  %p1217_p12 = scmp.lt.s32.totalorder %s20_s8, %s20_s8 }
  0x1c   :  { %p1213_p11 = scmp.ne.s32.totalorder %s20_s8, %s1212_s1  ;;  %p1218_p13 = scmp.lt.s32.totalorder %s1212_s1, %s1212_s1 }
  0x1e   :  { %p1219_p0 = por %p1218_p13, %p1217_p12 }
  0x20   :  { %p1220_p1 = pnand %p1219_p0, %p1213_p11 }
  0x22   :  { %1223 = shalt.err (!%p1220_p1)
}
  0x23   :  { %22 = dma.hbm_to_vmem [thread:$0]  %s1401_s0, 128, %s20_s8, [#allocation3]  }
  0x24   :  { %s1224_s22 = scalar_lea.hbm %s1403_s2, 8192 }
  0x25   :  { %p1225_p2 = scmp.ne.s32.totalorder %s1403_s2, %s1224_s22  ;;  %p1228_p3 = scmp.lt.u32.totalorder %s1224_s22, %s1403_s2 }
  0x27   :  { %p1230_p4 = pnand %p1228_p3, %p1225_p2 }
  0x29   :  { %1233 = shalt.err (!%p1230_p4)
}
  0x2a   :  { %s1234_s27 = scalar_lea.vmem %s41_s10, 8192  ;;  %p1239_p6 = scmp.lt.s32.totalorder %s41_s10, %s41_s10 }
  0x2b   :  { %p1235_p5 = scmp.ne.s32.totalorder %s41_s10, %s1234_s27  ;;  %p1240_p7 = scmp.lt.s32.totalorder %s1234_s27, %s1234_s27 }
  0x2d   :  { %p1241_p8 = por %p1240_p7, %p1239_p6 }
  0x2f   :  { %p1242_p9 = pnand %p1241_p8, %p1235_p5 }
  0x31   :  { %1245 = shalt.err (!%p1242_p9)
}
  0x32   :  { %s1279_s0 = smov 128   ;;  %s1280_s28 = smov 8  }
  0x33   :  { %46 = dma.hbm_to_vmem [thread:$0]  %s1403_s2, 8192, %s41_s10, [#allocation5], %s1279_s0, %s1279_s0, %s1280_s28  }
  0x34   :  { %s1281_s6 = smov [#allocation7]   ;;  %s1246_s11 = scalar_lea.hbm %s1404_s3, 2048 }
  0x35   :  { %s52_s7 = sshll.u32 %s1281_s6, 4  ;;  %p1247_p10 = scmp.ne.s32.totalorder %s1404_s3, %s1246_s11  ;;  %s53_s7 = int_to_ptr.vmem [resolvable:$true] %s52_s7 }
  0x36   :  { %p1250_p11 = scmp.lt.u32.totalorder %s1246_s11, %s1404_s3 }
  0x38   :  { %p1252_p12 = pnand %p1250_p11, %p1247_p10 }
  0x3a   :  { %1255 = shalt.err (!%p1252_p12)
}
  0x3b   :  { %s1256_s16 = scalar_lea.vmem %s53_s7, 2048  ;;  %p1261_p0 = scmp.lt.s32.totalorder %s53_s7, %s53_s7 }
  0x3c   :  { %p1257_p13 = scmp.ne.s32.totalorder %s53_s7, %s1256_s16  ;;  %p1262_p1 = scmp.lt.s32.totalorder %s1256_s16, %s1256_s16 }
  0x3e   :  { %p1263_p2 = por %p1262_p1, %p1261_p0 }
  0x40   :  { %p1264_p3 = pnand %p1263_p2, %p1257_p13 }
  0x42   :  { %1267 = shalt.err (!%p1264_p3)
}
  0x43   :  { %s1282_s2 = smov 64   ;;  %s1283_s10 = smov 4  }
  0x44   :  { %58 = dma.hbm_to_vmem [thread:$0]  %s1404_s3, 2048, %s53_s7, [#allocation8], %s1282_s2, %s1282_s2, %s1283_s10  }
  0x45   :  { %1268 = dma.done.wait [#allocation3], 128  }
  0x46   :  { %1269 = vsyncadd [#allocation3], 4294967168 }
  0x47   :  { %1270 = dma.done.wait [#allocation5], 8960  }
  0x48   :  { %1271 = vsyncadd [#allocation5], 4294958336 }
  0x49   :  { %1272 = dma.done.wait [#allocation8], 2048  }
  0x4a   :  { %1273 = vsyncadd [#allocation8], 4294965248  ;;  %v1284_v0 = vmov 0   ;;  %v1058_v1 = vld [vmem:[#allocation4 + $0x4] ss:$16 sps:$4 sm:$0xff]   ;;  %vm138_vm0 = vcmask 1043456  }
  0x4b   :  { %183 = vmatprep.mubr.bf16.mxu0 %v1284_v0  ;;  %v1060_v2 = vld [vmem:[#allocation4] ss:$16 sps:$4 sm:$0xff]   ;;  %151 = vmatprep.subr.bf16.mxu0 %v1058_v1  ;;  %v74_v6 = vld [vmem:[#allocation2] sm:$0xff]  ;;  %v81_v8 = vld [vmem:[#allocation4 + $0x28] sm:$0xff]  ;;  %vm134_vm1 = vcmask 195584   ;;  %vm917_vm2 = vcmask 7168  }
  0x4c   :  { %v80_v3 = vld [vmem:[#allocation4 + $0x20] sm:$0xff]  ;;  %152 = vmatpush1.bf16.msra.mxu0 %v1060_v2  ;;  %v1065_v7 = vld [vmem:[#allocation4 + $0xc] ss:$16 sps:$4 sm:$0xff]   ;;  %v1070_v11 = vld [vmem:[#allocation6] ss:$8 sps:$4 sm:$0xff]   ;;  %v75_v13 = vpack.c.bf16 %v74_v6, %v74_v6  ;;  %v933_v15 = vcombine.high %v81_v8, %v81_v8  ;;  %v932_v16 = vcombine.low %v81_v8, %v81_v8 }
  0x4d   :  { %v931_v4 = vcombine.high %v80_v3, %v80_v3  ;;  %v930_v5 = vcombine.low %v80_v3, %v80_v3  ;;  %v1068_v10 = vld [vmem:[#allocation6 + $0x4] ss:$8 sps:$4 sm:$0xff]   ;;  %v1071_v12 = vld [vmem:[#allocation6 + $0x14] ss:$8 sps:$4 sm:$0xff]   ;;  %v1063_v14 = vld [vmem:[#allocation4 + $0x8] ss:$16 sps:$4 sm:$0xff]  }
  0x4e   :  { %637 = vmatprep.subr.bf16.mxu1 %v1068_v10  ;;  %v1073_v17 = vld [vmem:[#allocation6 + $0x10] ss:$8 sps:$4 sm:$0xff]   ;;  %v1074_v18 = vld [vmem:[#allocation6 + $0x24] ss:$8 sps:$4 sm:$0xff]   ;;  %v146_v20 = vsel %vm138_vm0, %v932_v16, 0  ;;  %v84_v16 = vlaneseq }
  0x4f   :  { %934 = vmatprep.subr.msk.bf16.mxu0 %vm138_vm0, %v931_v4  ;;  %v140_v9 = vsel %vm138_vm0, %v930_v5, 0  ;;  %638 = vmatpush1.bf16.msra.mxu1 %v1070_v11  ;;  %v1078_v19 = vld [vmem:[#allocation6 + $0x104] ss:$8 sps:$4 sm:$0xff]   ;;  %v1079_v21 = vld [vmem:[#allocation6 + $0x20] ss:$8 sps:$4 sm:$0xff]  }
  0x50   :  { %154 = vmatpush1.bf16.msra.mxu0 %v140_v9  ;;  %639 = vmatprep.subr.bf16.mxu1 %v1071_v12  ;;  %v1080_v22 = vld [vmem:[#allocation6 + $0x34] ss:$8 sps:$4 sm:$0xff]   ;;  %v1076_v23 = vld [vmem:[#allocation6 + $0x100] ss:$8 sps:$4 sm:$0xff]   ;;  %v1085_v25 = vld [vmem:[#allocation6 + $0x30] ss:$8 sps:$4 sm:$0xff]  }
  0x51   :  { %192 = vmatprep.subr.bf16.mxu0 %v1065_v7  ;;  %v1084_v24 = vld [vmem:[#allocation6 + $0x114] ss:$8 sps:$4 sm:$0xff]   ;;  %v1086_v26 = vld [vmem:[#allocation6 + $0x44] ss:$8 sps:$4 sm:$0xff]   ;;  %v1082_v27 = vld [vmem:[#allocation6 + $0x110] ss:$8 sps:$4 sm:$0xff]  }
  0x52   :  { %v1090_v28 = vld [vmem:[#allocation6 + $0x124] ss:$8 sps:$4 sm:$0xff]   ;;  %v1091_v29 = vld [vmem:[#allocation6 + $0x40] ss:$8 sps:$4 sm:$0xff]   ;;  %v1092_v30 = vld [vmem:[#allocation6 + $0x54] ss:$8 sps:$4 sm:$0xff]  }
  0x53   :  { %935 = vmatmul.mubr.msk.bf16.vlgmr.msra.gmra.mrb[0].mxu0 %vm134_vm1, %v75_v13  ;;  %640 = vmatpush1.bf16.msra.mxu1 %v1073_v17  ;;  %v1088_v31 = vld [vmem:[#allocation6 + $0x120] ss:$8 sps:$4 sm:$0xff]   ;;  %v1096_v32 = vld [vmem:[#allocation6 + $0x134] ss:$8 sps:$4 sm:$0xff]   ;;  %v1097_v33 = vld [vmem:[#allocation6 + $0x50] ss:$8 sps:$4 sm:$0xff]  }
  0x54   :  { %193 = vmatpush1.bf16.msra.mxu0 %v1063_v14  ;;  %224 = vmatprep.mubr.bf16.mxu0 %v1284_v0  ;;  %v1098_v34 = vld [vmem:[#allocation6 + $0x64] ss:$8 sps:$4 sm:$0xff]   ;;  %v1094_v35 = vld [vmem:[#allocation6 + $0x130] ss:$8 sps:$4 sm:$0xff]   ;;  %v1103_v37 = vld [vmem:[#allocation6 + $0x60] ss:$8 sps:$4 sm:$0xff]  }
  0x55   :  { %936 = vmatprep.subr.msk.bf16.mxu0 %vm138_vm0, %v933_v15  ;;  %641 = vmatprep.subr.bf16.mxu1 %v1074_v18  ;;  %v1102_v36 = vld [vmem:[#allocation6 + $0x144] ss:$8 sps:$4 sm:$0xff]   ;;  %v1104_v38 = vld [vmem:[#allocation6 + $0x74] ss:$8 sps:$4 sm:$0xff]   ;;  %v1100_v39 = vld [vmem:[#allocation6 + $0x140] ss:$8 sps:$4 sm:$0xff]  }
  0x56   :  { %v1108_v40 = vld [vmem:[#allocation6 + $0x154] ss:$8 sps:$4 sm:$0xff]   ;;  %v1109_v41 = vld [vmem:[#allocation6 + $0x70] ss:$8 sps:$4 sm:$0xff]   ;;  %v1110_v42 = vld [vmem:[#allocation6 + $0x84] ss:$8 sps:$4 sm:$0xff]  }
  0x57   :  { %642 = vmatpush1.bf16.msra.mxu1 %v1079_v21  ;;  %v1106_v43 = vld [vmem:[#allocation6 + $0x150] ss:$8 sps:$4 sm:$0xff]   ;;  %v1114_v44 = vld [vmem:[#allocation6 + $0x164] ss:$8 sps:$4 sm:$0xff]   ;;  %v1115_v45 = vld [vmem:[#allocation6 + $0x80] ss:$8 sps:$4 sm:$0xff]  }
  0x58   :  { %195 = vmatpush1.bf16.msra.mxu0 %v146_v20  ;;  %643 = vmatprep.subr.bf16.mxu1 %v1080_v22  ;;  %v1112_v46 = vld [vmem:[#allocation6 + $0x160] ss:$8 sps:$4 sm:$0xff]   ;;  %v1116_v47 = vld [vmem:[#allocation6 + $0x94] ss:$8 sps:$4 sm:$0xff]   ;;  %v1121_v49 = vld [vmem:[#allocation6 + $0x90] ss:$8 sps:$4 sm:$0xff]  }
  0x59   :  { %678 = vmatprep.subr.bf16.mxu0 %v1078_v19  ;;  %v1120_v48 = vld [vmem:[#allocation6 + $0x174] ss:$8 sps:$4 sm:$0xff]   ;;  %v1122_v50 = vld [vmem:[#allocation6 + $0xa4] ss:$8 sps:$4 sm:$0xff]   ;;  %v1118_v51 = vld [vmem:[#allocation6 + $0x170] ss:$8 sps:$4 sm:$0xff]  }
  0x5a   :  { %v1126_v52 = vld [vmem:[#allocation6 + $0x184] ss:$8 sps:$4 sm:$0xff]   ;;  %v1127_v53 = vld [vmem:[#allocation6 + $0xa0] ss:$8 sps:$4 sm:$0xff]   ;;  %v1128_v54 = vld [vmem:[#allocation6 + $0xb4] ss:$8 sps:$4 sm:$0xff]  }
  0x5b   :  { %937 = vmatmul.mubr.msk.bf16.vlgmr.msra.gmra.mrb[4].mxu0 %vm134_vm1, %v75_v13  ;;  %644 = vmatpush1.bf16.msra.mxu1 %v1085_v25  ;;  %v1124_v55 = vld [vmem:[#allocation6 + $0x180] ss:$8 sps:$4 sm:$0xff]   ;;  %v1132_v56 = vld [vmem:[#allocation6 + $0x194] ss:$8 sps:$4 sm:$0xff]   ;;  %v1133_v57 = vld [vmem:[#allocation6 + $0xb0] ss:$8 sps:$4 sm:$0xff]  }
  0x5c   :  { %679 = vmatpush1.bf16.msra.mxu0 %v1076_v23  ;;  %645 = vmatprep.subr.bf16.mxu1 %v1086_v26  ;;  %v1134_v58 = vld [vmem:[#allocation6 + $0xc4] ss:$8 sps:$4 sm:$0xff]   ;;  %v1130_v59 = vld [vmem:[#allocation6 + $0x190] ss:$8 sps:$4 sm:$0xff]   ;;  %v1139_v61 = vld [vmem:[#allocation6 + $0xc0] ss:$8 sps:$4 sm:$0xff]  }
  0x5d   :  { %680 = vmatprep.subr.bf16.mxu0 %v1084_v24  ;;  %v1138_v60 = vld [vmem:[#allocation6 + $0x1a4] ss:$8 sps:$4 sm:$0xff]   ;;  %v1140_v62 = vld [vmem:[#allocation6 + $0xd4] ss:$8 sps:$4 sm:$0xff]   ;;  %v1136_v63 = vld [vmem:[#allocation6 + $0x1a0] ss:$8 sps:$4 sm:$0xff]  }
  0x5e   :  { %v1144_v0 = vld [vmem:[#allocation6 + $0x1b4] ss:$8 sps:$4 sm:$0xff]   ;;  %v1145_v1 = vld [vmem:[#allocation6 + $0xd0] ss:$8 sps:$4 sm:$0xff]   ;;  %v1146_v3 = vld [vmem:[#allocation6 + $0xe4] ss:$8 sps:$4 sm:$0xff]  }
  0x5f   :  { %646 = vmatpush1.bf16.msra.mxu1 %v1091_v29  ;;  %v1142_v2 = vld [vmem:[#allocation6 + $0x1b0] ss:$8 sps:$4 sm:$0xff]   ;;  %v1150_v4 = vld [vmem:[#allocation6 + $0x1c4] ss:$8 sps:$4 sm:$0xff]   ;;  %v1148_v5 = vld [vmem:[#allocation6 + $0x1c0] ss:$8 sps:$4 sm:$0xff]  }
  0x60   :  { %681 = vmatpush1.bf16.msra.mxu0 %v1082_v27  ;;  %647 = vmatprep.subr.bf16.mxu1 %v1092_v30  ;;  %v1151_v6 = vld [vmem:[#allocation6 + $0xe0] ss:$8 sps:$4 sm:$0xff]   ;;  %v1152_v7 = vld [vmem:[#allocation6 + $0xf4] ss:$8 sps:$4 sm:$0xff]   ;;  %v1154_v9 = vld [vmem:[#allocation6 + $0x1d0] ss:$8 sps:$4 sm:$0xff]  }
  0x61   :  { %682 = vmatprep.subr.bf16.mxu0 %v1090_v28  ;;  %v1156_v8 = vld [vmem:[#allocation6 + $0x1d4] ss:$8 sps:$4 sm:$0xff]   ;;  %v1157_v10 = vld [vmem:[#allocation6 + $0xf0] ss:$8 sps:$4 sm:$0xff]   ;;  %v1160_v11 = vld [vmem:[#allocation6 + $0x1e4] ss:$8 sps:$4 sm:$0xff]  }
  0x62   :  { %v1158_v12 = vld [vmem:[#allocation6 + $0x1e0] ss:$8 sps:$4 sm:$0xff]   ;;  %v1163_v13 = vld [vmem:[#allocation6 + $0x1f4] ss:$8 sps:$4 sm:$0xff]   ;;  %v1161_v14 = vld [vmem:[#allocation6 + $0x1f0] ss:$8 sps:$4 sm:$0xff]  }
  0x63   :  { %648 = vmatpush1.bf16.msra.mxu1 %v1097_v33  ;;  %v1164_v15 = vld [vmem:[#allocation7 + $0x40] sm:$0xff]   ;;  %v1369_v17 = vshrl.u32 %v84_v16, 7  ;;  %v82_v19 = vld [vmem:[%s1405_s4] sm:$0xf] }
  0x64   :  { %683 = vmatpush1.bf16.msra.mxu0 %v1088_v31  ;;  %649 = vmatprep.subr.bf16.mxu1 %v1098_v34 }
  0x65   :  { %684 = vmatprep.subr.bf16.mxu0 %v1096_v32  ;;  %v86_v18 = vsub.s32 0, %v1369_v17  ;;  %v90_v20 = vsub.s32 1, %v1369_v17  ;;  %v94_v26 = vsub.s32 2, %v1369_v17  ;;  %v98_v29 = vsub.s32 3, %v1369_v17  ;;  %v1002_v17 = vld [vmem:[%s1405_s4 + $0x6] ss:$0 sm:$0xff] }
  0x67   :  { %650 = vmatpush1.bf16.msra.mxu1 %v1103_v37  ;;  %v87_v21 = vrot.slane %v82_v19, %v86_v18  ;;  %v91_v22 = vrot.slane %v82_v19, %v90_v20  ;;  %v95_v33 = vrot.slane %v82_v19, %v94_v26 }
  0x68   :  { %685 = vmatpush1.bf16.msra.mxu0 %v1094_v35  ;;  %651 = vmatprep.subr.bf16.mxu1 %v1104_v38  ;;  %v99_v35 = vrot.slane %v82_v19, %v98_v29  ;;  %v1166_v38 = vld [vmem:[#allocation7 + $0x48] sm:$0xff]  }
  0x69   :  { %686 = vmatprep.subr.bf16.mxu0 %v1102_v36  ;;  %v1165_v36 = vld [vmem:[#allocation7] sm:$0xff]  }
  0x6b   :  { %652 = vmatpush1.bf16.msra.mxu1 %v1109_v41 }
  0x6c   :  { %687 = vmatpush1.bf16.msra.mxu0 %v1100_v39  ;;  %653 = vmatprep.subr.bf16.mxu1 %v1110_v42 }
  0x6d   :  { %688 = vmatprep.subr.bf16.mxu0 %v1108_v40 }
  0x6f   :  { %654 = vmatpush1.bf16.msra.mxu1 %v1115_v45 }
  0x70   :  { %689 = vmatpush1.bf16.msra.mxu0 %v1106_v43  ;;  %655 = vmatprep.subr.bf16.mxu1 %v1116_v47  ;;  %v1168_v47 = vld [vmem:[#allocation7 + $0x50] sm:$0xff]  }
  0x71   :  { %690 = vmatprep.subr.bf16.mxu0 %v1114_v44  ;;  %v1167_v44 = vld [vmem:[#allocation7 + $0x8] sm:$0xff]  }
  0x73   :  { %656 = vmatpush1.bf16.msra.mxu1 %v1121_v49 }
  0x74   :  { %691 = vmatpush1.bf16.msra.mxu0 %v1112_v46  ;;  %657 = vmatprep.subr.bf16.mxu1 %v1122_v50  ;;  %v1169_v50 = vld [vmem:[#allocation7 + $0x10] sm:$0xff]  }
  0x75   :  { %692 = vmatprep.subr.bf16.mxu0 %v1120_v48 }
  0x77   :  { %658 = vmatpush1.bf16.msra.mxu1 %v1127_v53  ;;  %v1171_v53 = vld [vmem:[#allocation7 + $0x18] sm:$0xff]  }
  0x78   :  { %693 = vmatpush1.bf16.msra.mxu0 %v1118_v51  ;;  %659 = vmatprep.subr.bf16.mxu1 %v1128_v54  ;;  %v1172_v54 = vld [vmem:[#allocation7 + $0x60] sm:$0xff]  }
  0x79   :  { %694 = vmatprep.subr.bf16.mxu0 %v1126_v52  ;;  %v1170_v52 = vld [vmem:[#allocation7 + $0x58] sm:$0xff]  }
  0x7b   :  { %660 = vmatpush1.bf16.msra.mxu1 %v1133_v57  ;;  %v1175_v57 = vld [vmem:[#allocation7 + $0x28] sm:$0xff]  }
  0x7c   :  { %695 = vmatpush1.bf16.msra.mxu0 %v1124_v55  ;;  %661 = vmatprep.subr.bf16.mxu1 %v1134_v58  ;;  %v1173_v55 = vld [vmem:[#allocation7 + $0x20] sm:$0xff]   ;;  %v1176_v58 = vld [vmem:[#allocation7 + $0x70] sm:$0xff]  }
  0x7d   :  { %696 = vmatprep.subr.bf16.mxu0 %v1132_v56  ;;  %v1174_v56 = vld [vmem:[#allocation7 + $0x68] sm:$0xff]  }
  0x7f   :  { %662 = vmatpush1.bf16.msra.mxu1 %v1139_v61  ;;  %v1179_v61 = vld [vmem:[#allocation7 + $0x38] sm:$0xff]  }
  0x80   :  { %697 = vmatpush1.bf16.msra.mxu0 %v1130_v59  ;;  %663 = vmatprep.subr.bf16.mxu1 %v1140_v62  ;;  %v1177_v59 = vld [vmem:[#allocation7 + $0x30] sm:$0xff]   ;;  %v305_v62 = vld [vmem:[%s1405_s4 + $0x4] sm:$0x3] }
  0x81   :  { %698 = vmatprep.subr.bf16.mxu0 %v1138_v60  ;;  %v1178_v60 = vld [vmem:[#allocation7 + $0x78] sm:$0xff]  }
  0x83   :  { %664 = vmatpush1.bf16.msra.mxu1 %v1145_v1 }
  0x84   :  { %699 = vmatpush1.bf16.msra.mxu0 %v1136_v63  ;;  %665 = vmatprep.subr.bf16.mxu1 %v1146_v3 }
  0x85   :  { %700 = vmatprep.subr.bf16.mxu0 %v1144_v0 }
  0x87   :  { %666 = vmatpush1.bf16.msra.mxu1 %v1151_v6 }
  0x88   :  { %701 = vmatpush1.bf16.msra.mxu0 %v1142_v2  ;;  %667 = vmatprep.subr.bf16.mxu1 %v1152_v7  ;;  %v310_v2 = vrot.slane %v305_v62, %v86_v18 }
  0x89   :  { %702 = vmatprep.subr.bf16.mxu0 %v1150_v4  ;;  %v314_v4 = vrot.slane %v305_v62, %v90_v20 }
  0x8b   :  { %668 = vmatpush1.bf16.msra.mxu1 %v1157_v10 }
  0x8c   :  { %703 = vmatpush1.bf16.msra.mxu0 %v1148_v5  ;;  %1021 = vmatprep.subr.bf16.mxu1 %v1164_v15 }
  0x8d   :  { %704 = vmatprep.subr.bf16.mxu0 %v1156_v8 }
  0x90   :  { %705 = vmatpush1.bf16.msra.mxu0 %v1154_v9 }
  0x91   :  { %706 = vmatprep.subr.bf16.mxu0 %v1160_v11 }
  0x94   :  { %707 = vmatpush1.bf16.msra.mxu0 %v1158_v12 }
  0x95   :  { %708 = vmatprep.subr.bf16.mxu0 %v1163_v13 }
  0x98   :  { %709 = vmatpush1.bf16.msra.mxu0 %v1161_v14 }
 0x126   :  { %v185_v23 = vpop.f32.mrb[0].mxu0 }
 0x127   :  { %v186_v24 = vadd.f32 %v185_v23, %v87_v21  ;;  %v187_v25 = vpop.f32.mrb[1].mxu0 }
 0x128   :  { %v188_v27 = vadd.f32 %v187_v25, %v91_v22  ;;  %v189_v28 = vpop.f32.mrb[2].mxu0 }
 0x129   :  { %v233_v30 = vmax.f32 %v186_v24, 0.0  ;;  %v190_v31 = vpop.f32.mrb[3].mxu0  ;;  %v1019_v24 = vld [vmem:[%s1405_s4 + $0x7] ss:$0 sm:$0xff] }
 0x12a   :  { %v234_v32 = vmax.f32 %v188_v27, 0.0  ;;  %v1020_v27 = vld [vmem:[%s1405_s4 + $0x8] ss:$0 sm:$0xff] }
 0x12b   :  { %v237_v37 = vpack.c.bf16 %v233_v30, %v233_v30 }
 0x12c   :  { %v238_v34 = vpack.c.bf16 %v234_v32, %v234_v32 }
 0x12e   :  { %v226_v39 = vpop.f32.mrb[4].mxu0  ;;  %669 = vmatprep.mubr.bf16.mxu1 %v238_v34 }
 0x12f   :  { %v227_v40 = vadd.f32 %v226_v39, %v95_v33  ;;  %v228_v41 = vpop.f32.mrb[5].mxu0  ;;  %670 = vmatmul.mubr.bf16.vlgmr.msra.gmra.mrb[0].mxu1 %v237_v37 }
 0x130   :  { %v229_v42 = vadd.f32 %v228_v41, %v99_v35  ;;  %v230_v43 = vpop.f32.mrb[6].mxu0  ;;  %1022 = vmatpush3.bf16.msra.mxu1 %v1165_v36 }
 0x131   :  { %v235_v45 = vmax.f32 %v227_v40, 0.0  ;;  %v231_v46 = vpop.f32.mrb[7].mxu0  ;;  %1023 = vmatprep.subr.bf16.mxu1 %v1166_v38 }
 0x132   :  { %v236_v48 = vmax.f32 %v229_v42, 0.0 }
 0x133   :  { %v239_v51 = vpack.c.bf16 %v235_v45, %v235_v45 }
 0x134   :  { %v240_v49 = vpack.c.bf16 %v236_v48, %v236_v48  ;;  %1024 = vmatpush3.bf16.msra.mxu1 %v1167_v44 }
 0x135   :  { %1025 = vmatprep.subr.bf16.mxu1 %v1168_v47 }
 0x136   :  { %710 = vmatprep.mubr.bf16.mxu0 %v240_v49 }
 0x137   :  { %711 = vmatmul.mubr.bf16.vlgmr.msra.gmra.mrb[8].mxu0 %v239_v51 }
 0x138   :  { %1026 = vmatpush3.bf16.msra.mxu1 %v1169_v50 }
 0x139   :  { %1027 = vmatprep.subr.bf16.mxu1 %v1170_v52 }
 0x13c   :  { %1028 = vmatpush3.bf16.msra.mxu1 %v1171_v53 }
 0x13d   :  { %1029 = vmatprep.subr.bf16.mxu1 %v1172_v54 }
 0x140   :  { %1030 = vmatpush3.bf16.msra.mxu1 %v1173_v55 }
 0x141   :  { %1031 = vmatprep.subr.bf16.mxu1 %v1174_v56 }
 0x144   :  { %1032 = vmatpush3.bf16.msra.mxu1 %v1175_v57 }
 0x145   :  { %1033 = vmatprep.subr.bf16.mxu1 %v1176_v58 }
 0x148   :  { %1034 = vmatpush3.bf16.msra.mxu1 %v1177_v59 }
 0x149   :  { %1035 = vmatprep.subr.bf16.mxu1 %v1178_v60 }
 0x14c   :  { %1036 = vmatpush3.bf16.msra.mxu1 %v1179_v61 }
 0x202   :  { %v671_v63 = vpop.f32.mrb[0].mxu1 }
 0x203   :  { %v673_v0 = vpop.f32.mrb[1].mxu1  ;;  %v672_v5 = vadd.f32 %v671_v63, %v310_v2 }
 0x204   :  { %v675_v1 = vpop.f32.mrb[2].mxu1  ;;  %v674_v6 = vadd.f32 %v673_v0, %v314_v4 }
 0x205   :  { %v676_v3 = vpop.f32.mrb[3].mxu1 }
 0x20a   :  { %v712_v7 = vpop.f32.mrb[8].mxu0 }
 0x20b   :  { %v713_v8 = vadd.f32 %v712_v7, %v672_v5  ;;  %v714_v9 = vpop.f32.mrb[9].mxu0 }
 0x20c   :  { %v715_v10 = vadd.f32 %v714_v9, %v674_v6  ;;  %v716_v11 = vpop.f32.mrb[10].mxu0 }
 0x20d   :  { %v719_v12 = vmax.f32 %v713_v8, 0.0  ;;  %v717_v13 = vpop.f32.mrb[11].mxu0 }
 0x20e   :  { %v720_v14 = vmax.f32 %v715_v10, 0.0 }
 0x20f   :  { %v721_v16 = vpack.c.bf16 %v719_v12, %v719_v12 }
 0x210   :  { %v722_v15 = vpack.c.bf16 %v720_v14, %v720_v14 }
 0x212   :  { %890 = vmatprep.mubr.bf16.mxu1 %v722_v15 }
 0x213   :  { %891 = vmatmul.mubr.bf16.vlgmr.msra.gmra.mrb[4].mxu1 %v721_v16 }
 0x2e6   :  { %v1037_v19 = vpop.f32.mrb[4].mxu1 }
 0x2e7   :  { %v1038_v18 = vpop.f32.mrb[5].mxu1 }
 0x2e8   :  { %v1039_v20 = vadd.f32 %v1038_v18, %v1037_v19  ;;  %v1040_v21 = vpop.f32.mrb[6].mxu1 }
 0x2e9   :  { %v1041_v22 = vpop.f32.mrb[7].mxu1 }
 0x2ea   :  { %v893_v23 = vadd.f32 %v1039_v20, %v1002_v17 }
 0x2ec   :  { %v898_v25 = vmax.f32 %v893_v23, 0.0 }
 0x2ee   :  { %v907_v26 = vmul.f32 %v1019_v24, %v898_v25 }
 0x2f0   :  { %908 = vadd.xlane.f32.xlu0 %v907_v26 }
 0x37d   :  { %v909_v28 = vpop.xlane.xlu0 %908 }
 0x37e   :  { %v916_v29 = vadd.f32 %v1020_v27, %v909_v28 }
 0x380   :  { %918 = vst.msk [vmem:[%s1406_s5] sm:$0xff] %vm917_vm2, %v916_v29 }
 0x381   :  { %923 = vsyncpa [#allocation3], 1 }
 0x382   :  { %924 = vsyncpa [#allocation5], 1 }
 0x383   :  { %925 = vsyncpa [#allocation8], 1 }

</bundles_post_ra>
